<compile_context>
chip_gen: v5e
topology: v5e:2x2
jax: 0.10.0
libtpu: 0.0.40
codegen_flags: <defaults>
</compile_context>

<pallas_src>
import jax
import jax.numpy as jnp
from jax.experimental import pallas as pl
from jax.experimental.pallas import tpu as pltpu


def _sa_kernel(x_ref, w1_ref, w2_ref, o_ref):
    """One (TN, C, TR, L) activation block.

    x_ref  : (TN, C, TR, L)  VMEM   activations (spatial as dense rows x lanes)
    w1_ref : (Cr, C)         SMEM   conv1 weight (f32)
    w2_ref : (C, Cr)         SMEM   conv2 weight (f32)
    o_ref  : (TN, C, TR, L)  VMEM   gated output
    """
    C = x_ref.shape[1]
    Cr = w1_ref.shape[0]

    # conv1 (1x1) + ReLU.  Loop input channels outer so only the Cr accumulators
    # plus one input-channel tile are live at once; per-channel slices are
    # re-read from the VMEM ref at the point of use (no full-tile value).
    h = [None] * Cr
    for c in range(C):
        xc = x_ref[:, c, :, :].astype(jnp.float32)        # (TN, TR, L) dense tile
        for cr in range(Cr):
            term = w1_ref[cr, c] * xc
            h[cr] = term if h[cr] is None else h[cr] + term
    h = [jnp.maximum(v, 0.0) for v in h]

    # conv2 (1x1) + Sigmoid + gate; store each output channel directly.
    for c in range(C):
        acc = w2_ref[c, 0] * h[0]
        for cr in range(1, Cr):
            acc = acc + w2_ref[c, cr] * h[cr]
        y = jax.nn.sigmoid(acc)                            # EUP transcendental
        xc = x_ref[:, c, :, :].astype(jnp.float32)
        o_ref[:, c, :, :] = (xc * y).astype(o_ref.dtype)


def _pick_lane(hw):
    """Lane width L (multiple of 128). Prefer >=8 rows without padding, then
    any no-padding option, else 128 (wrapper pads HW up to a multiple of L)."""
    candidates = (512, 256, 128)
    for L in candidates:
        if hw % L == 0 and hw // L >= 8:
            return L
    for L in candidates:
        if hw % L == 0:
            return L
    return 128


def _choose_tiling(n, c, r, lane, itemsize, target_bytes):
    """Pick (TN, TR): rows per block (multiple of 8 or full extent) and images
    per block, targeting ~target_bytes per block while keeping >=2 grid steps
    when N >= 2 (so v7x megacore gets work on both TensorCores)."""
    row_bytes = c * lane * itemsize            # one spatial row across channels
    img_bytes = row_bytes * r
    if img_bytes >= target_bytes:
        tr = max(8, (target_bytes // row_bytes) // 8 * 8)
        return 1, min(tr, r)
    # Whole image fits in one block; batch several images per block but leave
    # at least two batch steps when possible.
    max_imgs = max(1, target_bytes // img_bytes)
    tn = min(max_imgs, max(1, n // 2)) if n >= 2 else 1
    return tn, r


def sa_layer(x_nchw, w1, w2, *, target_block_bytes=1 << 20):
    """SALayer forward.

    x_nchw : (N, C, H, W)
    w1     : (C//r, C)   -- Conv2d(C, C//r, 1, bias=False) weight, squeezed
    w2     : (C, C//r)   -- Conv2d(C//r, C, 1, bias=False) weight, squeezed
    """
    N, C, H, W = x_nchw.shape
    Cr = w1.shape[0]
    assert w1.shape == (Cr, C) and w2.shape == (C, Cr)

    HW = H * W
    lane = _pick_lane(HW)
    hw_pad = pl.cdiv(HW, lane) * lane

    x3 = x_nchw.reshape(N, C, HW)                          # free view
    if hw_pad != HW:
        # Pad only when HW is not a multiple of the lane width (copy, but keeps
        # every block lane-dense and bounded instead of a full-extent fallback).
        x3 = jnp.pad(x3, ((0, 0), (0, 0), (0, hw_pad - HW)))
    R = hw_pad // lane
    x4 = x3.reshape(N, C, R, lane)                         # free view of x3

    tn, tr = _choose_tiling(N, C, R, lane, x4.dtype.itemsize, target_block_bytes)
    grid = (pl.cdiv(N, tn), pl.cdiv(R, tr))

    # Weights cast once in the wrapper; held in SMEM inside the kernel.
    w1f = w1.astype(jnp.float32)
    w2f = w2.astype(jnp.float32)

    out4 = pl.pallas_call(
        _sa_kernel,
        out_shape=jax.ShapeDtypeStruct((N, C, R, lane), x_nchw.dtype),
        grid_spec=pltpu.PrefetchScalarGridSpec(
            num_scalar_prefetch=0,
            grid=grid,
            in_specs=[
                pl.BlockSpec((tn, C, tr, lane), lambda n, r: (n, 0, r, 0)),
                pl.BlockSpec(memory_space=pltpu.MemorySpace.SMEM),
                pl.BlockSpec(memory_space=pltpu.MemorySpace.SMEM),
            ],
            out_specs=pl.BlockSpec((tn, C, tr, lane), lambda n, r: (n, 0, r, 0)),
        ),
        compiler_params=pltpu.CompilerParams(
            dimension_semantics=("parallel", "parallel")),
    )(x4, w1f, w2f)

    out3 = out4.reshape(N, C, hw_pad)
    if hw_pad != HW:
        out3 = out3[:, :, :HW]
    return out3.reshape(N, C, H, W)


def sa_layer_ref(x_nchw, w1, w2):
    """Pure-JAX reference matching the PyTorch module semantics."""
    x = jnp.transpose(x_nchw, (0, 2, 3, 1))                # NHWC
    h = jnp.maximum(jnp.einsum("nhwc,oc->nhwo", x, w1), 0.0)
    y = jax.nn.sigmoid(jnp.einsum("nhwo,co->nhwc", h, w2))
    return jnp.transpose(x * y, (0, 3, 1, 2))


if __name__ == "__main__":
    # module config: channel=4, reduction=4 -> hidden = 1
    N, C, H, W = 2, 4, 16, 16
    reduction = 4
    Cr = C // reduction

    key = jax.random.PRNGKey(0)
    kx, k1, k2 = jax.random.split(key, 3)

    x = jax.random.normal(kx, (N, C, H, W), dtype=jnp.float32)
    # Conv2d kernels with k=1, bias=False, stored squeezed: (out_ch, in_ch)
    w1 = jax.random.normal(k1, (Cr, C), dtype=jnp.float32) * 0.5
    w2 = jax.random.normal(k2, (C, Cr), dtype=jnp.float32) * 0.5

    out = sa_layer(x, w1, w2)
    out = jax.block_until_ready(out)

    ref = sa_layer_ref(x, w1, w2)
    assert out.shape == (N, C, H, W)
    assert jnp.allclose(out, ref, atol=1e-5, rtol=1e-5), "mismatch vs reference"

    print("KERNEL_OK")
</pallas_src>

<mosaic_0001>
module attributes {stable_mosaic.version = 11 : i64} {
  func.func @_sa_kernel(%arg0: i32, %arg1: i32, %arg2: memref<1x4x1x256xf32, #tpu.memory_space<vmem>>, %arg3: memref<1x4xf32, #tpu.memory_space<smem>>, %arg4: memref<4x1xf32, #tpu.memory_space<smem>>, %arg5: memref<1x4x1x256xf32, #tpu.memory_space<vmem>>) attributes {dimension_semantics = [#tpu.dimension_semantics<parallel>, #tpu.dimension_semantics<parallel>], iteration_bounds = array<i64: 2, 1>, scalar_prefetch = 0 : i64, scratch_operands = 0 : i64, tpu.core_type = #tpu.core_type<tc>, window_params = [{transform_indices = @transform_0, window_bounds = array<i64: 1, 4, 1, 256>}, {transform_indices = @transform_1, window_bounds = array<i64: 1, 4>}, {transform_indices = @transform_2, window_bounds = array<i64: 4, 1>}, {transform_indices = @transform_3, window_bounds = array<i64: 1, 4, 1, 256>}]} {
    %c0 = arith.constant 0 : index
    %c0_0 = arith.constant 0 : index
    %c0_1 = arith.constant 0 : index
    %c0_2 = arith.constant 0 : index
    %0 = vector.load %arg2[%c0, %c0_0, %c0_1, %c0_2] : memref<1x4x1x256xf32, #tpu.memory_space<vmem>>, vector<1x1x1x256xf32>
    %1 = vector.shape_cast %0 : vector<1x1x1x256xf32> to vector<1x1x256xf32>
    %c0_3 = arith.constant 0 : index
    %c0_4 = arith.constant 0 : index
    %2 = memref.load %arg3[%c0_3, %c0_4] : memref<1x4xf32, #tpu.memory_space<smem>>
    %3 = vector.broadcast %2 : f32 to vector<1x1x256xf32>
    %4 = arith.mulf %3, %1 : vector<1x1x256xf32>
    %c0_5 = arith.constant 0 : index
    %c1 = arith.constant 1 : index
    %c0_6 = arith.constant 0 : index
    %c0_7 = arith.constant 0 : index
    %5 = vector.load %arg2[%c0_5, %c1, %c0_6, %c0_7] : memref<1x4x1x256xf32, #tpu.memory_space<vmem>>, vector<1x1x1x256xf32>
    %6 = vector.shape_cast %5 : vector<1x1x1x256xf32> to vector<1x1x256xf32>
    %c0_8 = arith.constant 0 : index
    %c1_9 = arith.constant 1 : index
    %7 = memref.load %arg3[%c0_8, %c1_9] : memref<1x4xf32, #tpu.memory_space<smem>>
    %8 = vector.broadcast %7 : f32 to vector<1x1x256xf32>
    %9 = arith.mulf %8, %6 : vector<1x1x256xf32>
    %10 = arith.addf %4, %9 : vector<1x1x256xf32>
    %c0_10 = arith.constant 0 : index
    %c2 = arith.constant 2 : index
    %c0_11 = arith.constant 0 : index
    %c0_12 = arith.constant 0 : index
    %11 = vector.load %arg2[%c0_10, %c2, %c0_11, %c0_12] : memref<1x4x1x256xf32, #tpu.memory_space<vmem>>, vector<1x1x1x256xf32>
    %12 = vector.shape_cast %11 : vector<1x1x1x256xf32> to vector<1x1x256xf32>
    %c0_13 = arith.constant 0 : index
    %c2_14 = arith.constant 2 : index
    %13 = memref.load %arg3[%c0_13, %c2_14] : memref<1x4xf32, #tpu.memory_space<smem>>
    %14 = vector.broadcast %13 : f32 to vector<1x1x256xf32>
    %15 = arith.mulf %14, %12 : vector<1x1x256xf32>
    %16 = arith.addf %10, %15 : vector<1x1x256xf32>
    %c0_15 = arith.constant 0 : index
    %c3 = arith.constant 3 : index
    %c0_16 = arith.constant 0 : index
    %c0_17 = arith.constant 0 : index
    %17 = vector.load %arg2[%c0_15, %c3, %c0_16, %c0_17] : memref<1x4x1x256xf32, #tpu.memory_space<vmem>>, vector<1x1x1x256xf32>
    %18 = vector.shape_cast %17 : vector<1x1x1x256xf32> to vector<1x1x256xf32>
    %c0_18 = arith.constant 0 : index
    %c3_19 = arith.constant 3 : index
    %19 = memref.load %arg3[%c0_18, %c3_19] : memref<1x4xf32, #tpu.memory_space<smem>>
    %20 = vector.broadcast %19 : f32 to vector<1x1x256xf32>
    %21 = arith.mulf %20, %18 : vector<1x1x256xf32>
    %22 = arith.addf %16, %21 : vector<1x1x256xf32>
    %cst = arith.constant 0.000000e+00 : f32
    %23 = vector.broadcast %cst : f32 to vector<1x1x256xf32>
    %24 = arith.maximumf %22, %23 : vector<1x1x256xf32>
    %c0_20 = arith.constant 0 : index
    %c0_21 = arith.constant 0 : index
    %25 = memref.load %arg4[%c0_20, %c0_21] : memref<4x1xf32, #tpu.memory_space<smem>>
    %26 = vector.broadcast %25 : f32 to vector<1x1x256xf32>
    %27 = arith.mulf %26, %24 : vector<1x1x256xf32>
    %28 = arith.negf %27 : vector<1x1x256xf32>
    %29 = math.exp %28 : vector<1x1x256xf32>
    %cst_22 = arith.constant 1.000000e+00 : f32
    %30 = vector.broadcast %cst_22 : f32 to vector<1x1x256xf32>
    %31 = arith.addf %30, %29 : vector<1x1x256xf32>
    %32 = arith.divf %30, %31 : vector<1x1x256xf32>
    %c0_23 = arith.constant 0 : index
    %c0_24 = arith.constant 0 : index
    %c0_25 = arith.constant 0 : index
    %c0_26 = arith.constant 0 : index
    %33 = vector.load %arg2[%c0_23, %c0_24, %c0_25, %c0_26] : memref<1x4x1x256xf32, #tpu.memory_space<vmem>>, vector<1x1x1x256xf32>
    %34 = vector.shape_cast %33 : vector<1x1x1x256xf32> to vector<1x1x256xf32>
    %35 = arith.mulf %34, %32 : vector<1x1x256xf32>
    %c0_27 = arith.constant 0 : index
    %c0_28 = arith.constant 0 : index
    %c0_29 = arith.constant 0 : index
    %c0_30 = arith.constant 0 : index
    %36 = vector.load %arg5[%c0_27, %c0_28, %c0_29, %c0_30] : memref<1x4x1x256xf32, #tpu.memory_space<vmem>>, vector<1x1x1x256xf32>
    %37 = vector.shape_cast %36 : vector<1x1x1x256xf32> to vector<1x1x256xf32>
    %38 = vector.shape_cast %35 : vector<1x1x256xf32> to vector<1x1x1x256xf32>
    tpu.vector_store %arg5[%c0_27, %c0_28, %c0_29, %c0_30], %38 {strides = array<i32>} : memref<1x4x1x256xf32, #tpu.memory_space<vmem>>, vector<1x1x1x256xf32>,
    %c1_31 = arith.constant 1 : index
    %c0_32 = arith.constant 0 : index
    %39 = memref.load %arg4[%c1_31, %c0_32] : memref<4x1xf32, #tpu.memory_space<smem>>
    %40 = vector.broadcast %39 : f32 to vector<1x1x256xf32>
    %41 = arith.mulf %40, %24 : vector<1x1x256xf32>
    %42 = arith.negf %41 : vector<1x1x256xf32>
    %43 = math.exp %42 : vector<1x1x256xf32>
    %cst_33 = arith.constant 1.000000e+00 : f32
    %44 = vector.broadcast %cst_33 : f32 to vector<1x1x256xf32>
    %45 = arith.addf %44, %43 : vector<1x1x256xf32>
    %46 = arith.divf %44, %45 : vector<1x1x256xf32>
    %c0_34 = arith.constant 0 : index
    %c1_35 = arith.constant 1 : index
    %c0_36 = arith.constant 0 : index
    %c0_37 = arith.constant 0 : index
    %47 = vector.load %arg2[%c0_34, %c1_35, %c0_36, %c0_37] : memref<1x4x1x256xf32, #tpu.memory_space<vmem>>, vector<1x1x1x256xf32>
    %48 = vector.shape_cast %47 : vector<1x1x1x256xf32> to vector<1x1x256xf32>
    %49 = arith.mulf %48, %46 : vector<1x1x256xf32>
    %c0_38 = arith.constant 0 : index
    %c1_39 = arith.constant 1 : index
    %c0_40 = arith.constant 0 : index
    %c0_41 = arith.constant 0 : index
    %50 = vector.load %arg5[%c0_38, %c1_39, %c0_40, %c0_41] : memref<1x4x1x256xf32, #tpu.memory_space<vmem>>, vector<1x1x1x256xf32>
    %51 = vector.shape_cast %50 : vector<1x1x1x256xf32> to vector<1x1x256xf32>
    %52 = vector.shape_cast %49 : vector<1x1x256xf32> to vector<1x1x1x256xf32>
    tpu.vector_store %arg5[%c0_38, %c1_39, %c0_40, %c0_41], %52 {strides = array<i32>} : memref<1x4x1x256xf32, #tpu.memory_space<vmem>>, vector<1x1x1x256xf32>,
    %c2_42 = arith.constant 2 : index
    %c0_43 = arith.constant 0 : index
    %53 = memref.load %arg4[%c2_42, %c0_43] : memref<4x1xf32, #tpu.memory_space<smem>>
    %54 = vector.broadcast %53 : f32 to vector<1x1x256xf32>
    %55 = arith.mulf %54, %24 : vector<1x1x256xf32>
    %56 = arith.negf %55 : vector<1x1x256xf32>
    %57 = math.exp %56 : vector<1x1x256xf32>
    %cst_44 = arith.constant 1.000000e+00 : f32
    %58 = vector.broadcast %cst_44 : f32 to vector<1x1x256xf32>
    %59 = arith.addf %58, %57 : vector<1x1x256xf32>
    %60 = arith.divf %58, %59 : vector<1x1x256xf32>
    %c0_45 = arith.constant 0 : index
    %c2_46 = arith.constant 2 : index
    %c0_47 = arith.constant 0 : index
    %c0_48 = arith.constant 0 : index
    %61 = vector.load %arg2[%c0_45, %c2_46, %c0_47, %c0_48] : memref<1x4x1x256xf32, #tpu.memory_space<vmem>>, vector<1x1x1x256xf32>
    %62 = vector.shape_cast %61 : vector<1x1x1x256xf32> to vector<1x1x256xf32>
    %63 = arith.mulf %62, %60 : vector<1x1x256xf32>
    %c0_49 = arith.constant 0 : index
    %c2_50 = arith.constant 2 : index
    %c0_51 = arith.constant 0 : index
    %c0_52 = arith.constant 0 : index
    %64 = vector.load %arg5[%c0_49, %c2_50, %c0_51, %c0_52] : memref<1x4x1x256xf32, #tpu.memory_space<vmem>>, vector<1x1x1x256xf32>
    %65 = vector.shape_cast %64 : vector<1x1x1x256xf32> to vector<1x1x256xf32>
    %66 = vector.shape_cast %63 : vector<1x1x256xf32> to vector<1x1x1x256xf32>
    tpu.vector_store %arg5[%c0_49, %c2_50, %c0_51, %c0_52], %66 {strides = array<i32>} : memref<1x4x1x256xf32, #tpu.memory_space<vmem>>, vector<1x1x1x256xf32>,
    %c3_53 = arith.constant 3 : index
    %c0_54 = arith.constant 0 : index
    %67 = memref.load %arg4[%c3_53, %c0_54] : memref<4x1xf32, #tpu.memory_space<smem>>
    %68 = vector.broadcast %67 : f32 to vector<1x1x256xf32>
    %69 = arith.mulf %68, %24 : vector<1x1x256xf32>
    %70 = arith.negf %69 : vector<1x1x256xf32>
    %71 = math.exp %70 : vector<1x1x256xf32>
    %cst_55 = arith.constant 1.000000e+00 : f32
    %72 = vector.broadcast %cst_55 : f32 to vector<1x1x256xf32>
    %73 = arith.addf %72, %71 : vector<1x1x256xf32>
    %74 = arith.divf %72, %73 : vector<1x1x256xf32>
    %c0_56 = arith.constant 0 : index
    %c3_57 = arith.constant 3 : index
    %c0_58 = arith.constant 0 : index
    %c0_59 = arith.constant 0 : index
    %75 = vector.load %arg2[%c0_56, %c3_57, %c0_58, %c0_59] : memref<1x4x1x256xf32, #tpu.memory_space<vmem>>, vector<1x1x1x256xf32>
    %76 = vector.shape_cast %75 : vector<1x1x1x256xf32> to vector<1x1x256xf32>
    %77 = arith.mulf %76, %74 : vector<1x1x256xf32>
    %c0_60 = arith.constant 0 : index
    %c3_61 = arith.constant 3 : index
    %c0_62 = arith.constant 0 : index
    %c0_63 = arith.constant 0 : index
    %78 = vector.load %arg5[%c0_60, %c3_61, %c0_62, %c0_63] : memref<1x4x1x256xf32, #tpu.memory_space<vmem>>, vector<1x1x1x256xf32>
    %79 = vector.shape_cast %78 : vector<1x1x1x256xf32> to vector<1x1x256xf32>
    %80 = vector.shape_cast %77 : vector<1x1x256xf32> to vector<1x1x1x256xf32>
    tpu.vector_store %arg5[%c0_60, %c3_61, %c0_62, %c0_63], %80 {strides = array<i32>} : memref<1x4x1x256xf32, #tpu.memory_space<vmem>>, vector<1x1x1x256xf32>,
    return
  }
  func.func @transform_0(%arg0: i32, %arg1: i32) -> (i32, i32, i32, i32) {
    %c0_i32 = arith.constant 0 : i32
    %c0_i32_0 = arith.constant 0 : i32
    %c0_i32_1 = arith.constant 0 : i32
    return %arg0, %c0_i32, %arg1, %c0_i32_0 : i32, i32, i32, i32
  }
  func.func @transform_1(%arg0: i32, %arg1: i32) -> (i32, i32) {
    %c0_i32 = arith.constant 0 : i32
    %c0_i32_0 = arith.constant 0 : i32
    %c0_i32_1 = arith.constant 0 : i32
    return %c0_i32, %c0_i32_0 : i32, i32
  }
  func.func @transform_2(%arg0: i32, %arg1: i32) -> (i32, i32) {
    %c0_i32 = arith.constant 0 : i32
    %c0_i32_0 = arith.constant 0 : i32
    %c0_i32_1 = arith.constant 0 : i32
    return %c0_i32, %c0_i32_0 : i32, i32
  }
  func.func @transform_3(%arg0: i32, %arg1: i32) -> (i32, i32, i32, i32) {
    %c0_i32 = arith.constant 0 : i32
    %c0_i32_0 = arith.constant 0 : i32
    %c0_i32_1 = arith.constant 0 : i32
    return %arg0, %c0_i32, %arg1, %c0_i32_0 : i32, i32, i32, i32
  }
}

</mosaic_0001>

<bundles_post_ra>
// kernel: tpu_custom_call.1
= control target key start
LH: loop header
LB: loop body
LE: loop exit
PB: predicated region body
PF: predicated region fallthrough
CT: control target
= control target key end

     0   :  { %s1051_s0 = inlined_call_operand.hbm [shape: f32[2,4,1,256], index: 0, kind: input, shape index: {}]   ;;  %s1052_s1 = inlined_call_operand.vmem [shape: f32[1,4], index: 1, kind: input, shape index: {}]   ;;  %s1053_s2 = inlined_call_operand.vmem [shape: f32[4,1], index: 2, kind: input, shape index: {}]   ;;  %s1054_s3 = inlined_call_operand.hbm [shape: f32[2,4,1,256], index: 3, kind: output, shape index: {}]  }
   0x1   :  { %1055 = sst [smem:[#allocation14_spill]] %s1052_s1 }
   0x2   :  { %8 = vsyncpa [#allocation3], 0 }
   0x3   :  { %10 = vsyncpa [#allocation3 + $0x1], 0 }
   0x4   :  { %11 = vsyncpa [#allocation5], 0 }
   0x5   :  { %12 = vsyncpa [#allocation8], 0 }
   0x6   :  { %13 = vsyncpa [#allocation4], 0 }
   0x7   :  { %15 = vsyncpa [#allocation4 + $0x1], 0  ;;  %s805_s12 = smov 0   ;;  %s807_s13 = smov 0  }
   0x8   :  { %s809_s14 = smov 0   ;;  %s811_s15 = smov 0  }
   0x9   :  { %s813_s16 = smov 0   ;;  %s815_s17 = smov 0  }
   0xa LB: > { %s488_s18 = sadd.s32 4294967295, %s777_s17   ;;  %s489_s19 = sadd.s32 4294967294, %s777_s17   ;;  %s777_s17 = sphi %s815_s17, %s21_s17   ;;  %s773_s16 = sphi %s813_s16, %s1084_s16   ;;  %s769_s15 = sphi %s811_s15, %s1083_s15   ;;  %s765_s14 = sphi %s809_s14, %s1082_s14   ;;  %s761_s13 = sphi %s807_s13, %s1081_s13   ;;  %s757_s12 = sphi %s805_s12, %s1080_s12  }
   0xb   : > { %s42_s20 = sadd.s32 1, %s765_s14  ;;  %p49_p0 = scmp.ne.s32.totalorder %s765_s14, %s761_s13 }
   0xc   : > { %p50_p1 = scmp.eq.s32.totalorder %s777_s17, 0  ;;  %p55_p2 = scmp.ne.s32.totalorder %s761_s13, %s757_s12 }
   0xd   : > { %p843_p3 = scmp.eq.s32.totalorder %s488_s18, 0  ;;  %p123_p4 = scmp.eq.s32.totalorder %s488_s18, 1 }
   0xe   : > { %p847_p5 = por %p50_p1, %p49_p0  ;;  %p129_p6 = scmp.eq.s32.totalorder %s489_s19, 1 }
   0xf   : > { %p853_p7 = por %p843_p3, %p55_p2  ;;  %p857_p8 = por %p123_p4, %p49_p0 }
  0x10   : > { %p861_p9 = por %p129_p6, %p55_p2  ;;  %p490_p10 = scmp.ge.s32.totalorder %s777_s17, 1 }
  0x11   : > { %p136_p11 = scmp.lt.s32.totalorder %s777_s17, 3  ;;  %s1061_s1 = sld [smem:[#allocation14_spill]] }
  0x12   : > { %p493_p13 = scmp.ge.s32.totalorder %s777_s17, 2  ;;  %p553_p0 = scmp.lt.s32.totalorder %s777_s17, 2 }
  0x13   : > { %p870_p12 = pnand %p490_p10, %p136_p11  ;;  %s158_s5 = sshll.u32 %s1053_s2, 4  ;;  %s159_s5 = int_to_ptr.vmem [resolvable:$true] %s158_s5 }
  0x14   : > { %p883_p2 = pnand %p553_p0, %p847_p5  ;;  %s779_s7 = smov [#allocation6]  }
  0x15   : > { %p536_p1 = pneg %p870_p12  ;;  %s780_s8 = smov [#allocation7]  }
  0x16   : > { %s33_s9 = sadd.s32 1, %s773_s16  ;;  %s169_s10 = sand.u32 1, %s765_s14  }
  0x17   : > { %s148_s28 = sshll.u32 %s1061_s1, 4  ;;  %p537_p4 = pnand %p536_p1, %p843_p3  ;;  %s149_s28 = int_to_ptr.vmem [resolvable:$true] %s148_s28 }
  0x18   : > { %p35_p6 = scmp.ge.s32.totalorder %s33_s9, 2  ;;  %s494_s11 = sshll.u32 %s169_s10, 3 }
  0x19   : > { %539 = dma.vmem_to_smem (!%p537_p4), %s149_s28, 16, %s779_s7, [#allocation5]  }
  0x1a   : > { %542 = dma.vmem_to_smem (!%p537_p4), %s159_s5, 64, %s780_s8, [#allocation8]  }
  0x1b   : > { %s495_s18 = sshll.u32 %s773_s16, 3  ;;  %s1086_s9 = smov (%p35_p6, %s33_s9), 0 }
  0x1c   : > { %s179_s26 = scalar_lea.hbm %s1051_s0, %s495_s18  ;;  %s37_s27 = ssub.s32 %s773_s16, %s1086_s9 }
  0x1d   : > { %s180_s30 = sshll.u32 %s179_s26, 4  ;;  %p40_p5 = scmp.eq.s32.totalorder %s37_s27, 0  ;;  %s181_s30 = int_to_ptr.hbm [resolvable:$true] %s180_s30 }
  0x1e   : > { %s173_s28 = scalar_lea.vmem [#allocation2], %s494_s11  ;;  %s170_s7 = scalar_lea.sflag [#allocation3], %s169_s10 }
  0x1f   : > { %s182_s4 = sshll.u32 %s173_s28, 4  ;;  %s781_s8 = smov 32   ;;  %s183_s4 = int_to_ptr.vmem [resolvable:$true] %s182_s4 }
  0x20   : > { %s902_s5 = scalar_select %p40_p5, %s765_s14, %s42_s20  }
  0x21   : > { %s782_s1 = smov 2   ;;  %194 = sbr.rel (%p870_p12) target bundleno = 102 (0x66), region = 32 }
  0x22   : > { %546 = dma.hbm_to_vmem [thread:$0]  (!%p883_p2), %s181_s30, 128, %s183_s4, %s170_s7, %s781_s8, %s781_s8, %s782_s1  }
  0x23   : > { %s909_s18 = sand.u32 (!%p870_p12), 1, %s761_s13  }
  0x24   : > { %s497_s11 = sshll.u32 (!%p870_p12), %s909_s18, 3  ;;  %s197_s19 = scalar_lea.sflag (!%p870_p12), [#allocation3], %s909_s18 }
  0x25   : > { %s915_s20 = scalar_lea.vmem (!%p870_p12), [#allocation2], %s497_s11 }
  0x26   : > { %740 = dma.done.wait (%p853_p7), %s197_s19, 128  }
  0x27   : > { %742 = vsyncadd (%p853_p7), %s197_s19, 4294967168 }
  0x28   : > { %744 = dma.done.wait (%p843_p3), [#allocation5], 16  }
  0x29   : > { %746 = vsyncadd (%p843_p3), [#allocation5], 4294967280 }
  0x2a   : > { %748 = dma.done.wait (%p843_p3), [#allocation8], 64  }
  0x2b   : > { %750 = vsyncadd (%p843_p3), [#allocation8], 4294967232 }
  0x2c   : > { %216 = sfence }
  0x2d   : > { %s236_s1 = sld [smem:[#allocation6]]  ;;  %v930_v0 = vld [vmem:[%s915_s20] sm:$0x3]  ;;  %v501_v1 = vld [vmem:[%s915_s20 + $0x2] sm:$0x3]  ;;  %v281_v43 = vlaneseq  ;;  %s521_s27 = sshll.u32 %s769_s15, 3 }
  0x2e   : > { %s502_s23 = sld [smem:[#allocation6 + $0x1]]  ;;  %v503_v3 = vld [vmem:[%s915_s20 + $0x4] sm:$0x3]  ;;  %v505_v6 = vld [vmem:[%s915_s20 + $0x6] sm:$0x3]  ;;  %s377_s28 = scalar_lea.hbm %s1054_s3, %s521_s27 }
  0x2f   : > { %s504_s29 = sld [smem:[#allocation6 + $0x2]]  ;;  %vm965_vm12 = vcmp.lt.s32.totalorder %v281_v43, 256  ;;  %s234_s4 = scalar_lea.vmem [#allocation9], %s497_s11 }
  0x30   : > { %s506_s6 = sld [smem:[#allocation6 + $0x3]]  ;;  %s378_s7 = sshll.u32 %s234_s4, 4  ;;  %s1004_s7 = int_to_ptr.vmem [resolvable:$true] %s378_s7 }
  0x31   : > { %s258_s10 = sld [smem:[#allocation7]]  ;;  %s380_s8 = sshll.u32 %s377_s28, 4  ;;  %s381_s8 = int_to_ptr.hbm [resolvable:$true] %s380_s8 }
  0x32   : > { %s508_s22 = sld [smem:[#allocation7 + $0x80]]  ;;  %s365_s11 = scalar_lea.sflag [#allocation4], %s909_s18 }
  0x33   : > { %v237_v2 = vstv %s236_s1  ;;  %s512_s26 = sld [smem:[#allocation7 + $0x100]]  ;;  %s701_s19 = sshra.s32 %s381_s8, 4  ;;  %s702_s19 = int_to_ptr.hbm [resolvable:$true] %s701_s19 }
  0x34   : > { %v238_v4 = vmul.f32 %v237_v2, %v930_v0  ;;  %v242_v5 = vstv %s502_s23  ;;  %s516_s21 = sld [smem:[#allocation7 + $0x180]]  ;;  %p708_p11 = scmp.lt.s32.totalorder %s702_s19, %s1054_s3 }
  0x35   : > { %v243_v7 = vmul.f32 %v501_v1, %v242_v5  ;;  %v248_v8 = vstv %s504_s29  ;;  %s707_s29 = scalar_lea.hbm %s1054_s3, 16 }
  0x36   : > { %v249_v9 = vmul.f32 %v503_v3, %v248_v8  ;;  %v254_v10 = vstv %s506_s6 }
  0x37   : > { %v244_v11 = vadd.f32 %v243_v7, %v238_v4  ;;  %v255_v12 = vmul.f32 %v505_v6, %v254_v10  ;;  %v259_v15 = vstv %s258_s10  ;;  %v510_v6 = vld [vmem:[%s915_s20 + $0x2] sm:$0x3] }
  0x38   : > { %v287_v16 = vstv %s508_s22 }
  0x39   : > { %v250_v13 = vadd.f32 %v249_v9, %v244_v11  ;;  %v313_v17 = vstv %s512_s26 }
  0x3a   : > { %v339_v18 = vstv %s516_s21 }
  0x3b   : > { %v256_v14 = vadd.f32 %v255_v12, %v250_v13 }
  0x3d   : > { %v257_v19 = vmax.f32 %v256_v14, 0.0 }
  0x3f   : > { %v260_v20 = vmul.f32 %v259_v15, %v257_v19  ;;  %v288_v21 = vmul.f32 %v287_v16, %v257_v19  ;;  %v314_v22 = vmul.f32 %v313_v17, %v257_v19  ;;  %v340_v23 = vmul.f32 %v339_v18, %v257_v19 }
  0x41   : > { %v507_v24 = vmul.f32 -1.442695, %v260_v20  ;;  %v509_v25 = vmul.f32 -1.442695, %v288_v21  ;;  %v513_v26 = vmul.f32 -1.442695, %v314_v22 }
  0x42   : > { %v517_v27 = vmul.f32 -1.442695, %v340_v23  ;;  %v514_v20 = vld [vmem:[%s915_s20 + $0x4] sm:$0x3]  ;;  %v518_v22 = vld [vmem:[%s915_s20 + $0x6] sm:$0x3] }
  0x43   : > { %611 = vpow2.f32 %v507_v24  ;;  %s703_s20 = scalar_lea.hbm %s702_s19, 8 }
  0x44   : > { %613 = vpow2.f32 %v509_v25  ;;  %p704_p3 = scmp.ne.s32.totalorder %s702_s19, %s703_s20  ;;  %p709_p12 = scmp.lt.s32.totalorder %s707_s29, %s703_s20 }
  0x45   : > { %615 = vpow2.f32 %v513_v26 }
  0x46   : > { %617 = vpow2.f32 %v517_v27  ;;  %p705_p7 = pnand %p704_p3, %p857_p8  ;;  %p710_p0 = por %p709_p12, %p708_p11 }
  0x48   : > { %p706_p10 = pneg %p705_p7 }
  0x49   : > { %v612_v28 = vpop.eup %611 }
  0x4a   : > { %v614_v29 = vpop.eup %613  ;;  %v264_v30 = vadd.f32 1.0, %v612_v28  ;;  %p711_p1 = pnand %p710_p0, %p706_p10 }
  0x4b   : > { %v616_v31 = vpop.eup %615  ;;  %v292_v32 = vadd.f32 1.0, %v614_v29 }
  0x4c   : > { %v618_v33 = vpop.eup %617  ;;  %619 = vrcp.f32 %v264_v30  ;;  %v318_v34 = vadd.f32 1.0, %v616_v31  ;;  %v274_v36 = vand.u32 2147483647, %v264_v30  ;;  %v276_v37 = vand.u32 2147483648, %v264_v30 }
  0x4d   : > { %621 = vrcp.f32 %v292_v32  ;;  %v936_v35 = vadd.f32 1.0, %v618_v33  ;;  %v302_v39 = vand.u32 2147483647, %v292_v32  ;;  %v304_v40 = vand.u32 2147483648, %v292_v32 }
  0x4e   : > { %623 = vrcp.f32 %v318_v34  ;;  %vm270_vm0 = vweird.f32 %v264_v30  ;;  %vm298_vm1 = vweird.f32 %v292_v32  ;;  %vm939_vm3 = vcmp.eq.f32.partialorder %v274_v36, 8.507059e+37 }
  0x4f   : > { %625 = vrcp.f32 %v936_v35  ;;  %v277_v47 = vor.u32 1.1754944e-38, %v276_v37  ;;  %vm943_vm5 = vcmp.eq.f32.partialorder %v302_v39, 8.507059e+37  ;;  %v305_v51 = vor.u32 1.1754944e-38, %v304_v40 }
  0x50   : > { %vm324_vm6 = vweird.f32 %v318_v34  ;;  %v328_v55 = vand.u32 2147483647, %v318_v34  ;;  %v330_v58 = vand.u32 2147483648, %v318_v34  ;;  %vm350_vm8 = vweird.f32 %v936_v35 }
  0x51   : > { %v356_v63 = vand.u32 2147483648, %v936_v35  ;;  %v354_v3 = vand.u32 2147483647, %v936_v35 }
  0x52   : > { %v620_v38 = vpop.eup %619  ;;  %vm970_vm13 = vcmp.eq.f32.partialorder %v328_v55, 8.507059e+37  ;;  %v331_v12 = vor.u32 1.1754944e-38, %v330_v58 }
  0x53   : > { %v622_v41 = vpop.eup %621  ;;  %v266_v42 = vmul.f32 %v620_v38, %v264_v30  ;;  %vm271_vm2 = vweird.f32 %v620_v38  ;;  %v357_v18 = vor.u32 1.1754944e-38, %v356_v63 }
  0x54   : > { %v294_v44 = vmul.f32 %v622_v41, %v292_v32  ;;  %v624_v48 = vpop.eup %623  ;;  %vm299_vm4 = vweird.f32 %v622_v41  ;;  %vm948_vm7 = vmor %vm270_vm0, %vm271_vm2  ;;  %vm355_vm0 = vcmp.eq.f32.partialorder %v354_v3, 8.507059e+37 }
  0x55   : > { %v267_v45 = vsub.f32 1.0, %v266_v42  ;;  %v626_v52 = vpop.eup %625  ;;  %v320_v54 = vmul.f32 %v624_v48, %v318_v34  ;;  %vm957_vm9 = vmor %vm298_vm1, %vm299_vm4  ;;  %vm325_vm10 = vweird.f32 %v624_v48 }
  0x56   : > { %v295_v49 = vsub.f32 1.0, %v294_v44  ;;  %v346_v59 = vmul.f32 %v626_v52, %v936_v35  ;;  %vm351_vm11 = vweird.f32 %v626_v52  ;;  %vm982_vm14 = vmor %vm324_vm6, %vm325_vm10 }
  0x57   : > { %v268_v53 = vmul.f32 %v620_v38, %v267_v45  ;;  %v321_v62 = vsub.f32 1.0, %v320_v54  ;;  %vm994_vm15 = vmor %vm350_vm8, %vm351_vm11 }
  0x58   : > { %v296_v57 = vmul.f32 %v622_v41, %v295_v49  ;;  %v347_v2 = vsub.f32 1.0, %v346_v59 }
  0x59   : > { %v269_v60 = vadd.f32 %v620_v38, %v268_v53  ;;  %v322_v7 = vmul.f32 %v624_v48, %v321_v62 }
  0x5a   : > { %v297_v1 = vadd.f32 %v622_v41, %v296_v57  ;;  %v348_v13 = vmul.f32 %v626_v52, %v347_v2 }
  0x5b   : > { %v273_v4 = vsel %vm948_vm7, %v620_v38, %v269_v60  ;;  %v323_v16 = vadd.f32 %v624_v48, %v322_v7 }
  0x5c   : > { %v278_v9 = vsel %vm939_vm3, %v277_v47, %v273_v4  ;;  %v301_v10 = vsel %vm957_vm9, %v622_v41, %v297_v1  ;;  %v349_v21 = vadd.f32 %v626_v52, %v348_v13 }
  0x5d   : > { %v280_v14 = vmul.f32 %v278_v9, %v930_v0  ;;  %v306_v15 = vsel %vm943_vm5, %v305_v51, %v301_v10  ;;  %v327_v0 = vsel %vm982_vm14, %v624_v48, %v323_v16 }
  0x5e   : > { %v309_v19 = vmul.f32 %v510_v6, %v306_v15  ;;  %v332_v23 = vsel %vm970_vm13, %v331_v12, %v327_v0  ;;  %v353_v24 = vsel %vm994_vm15, %v626_v52, %v349_v21 }
  0x5f   : > { %285 = vst.msk [vmem:[%s234_s4] sm:$0x3] %vm965_vm12, %v280_v14  ;;  %v335_v25 = vmul.f32 %v514_v20, %v332_v23  ;;  %v358_v26 = vsel %vm355_vm0, %v357_v18, %v353_v24 }
  0x60   : > { %511 = vst.msk [vmem:[%s234_s4 + $0x2] sm:$0x3] %vm965_vm12, %v309_v19  ;;  %v361_v27 = vmul.f32 %v518_v22, %v358_v26 }
  0x61   : > { %515 = vst.msk [vmem:[%s234_s4 + $0x4] sm:$0x3] %vm965_vm12, %v335_v25 }
  0x62   : > { %519 = vst.msk [vmem:[%s234_s4 + $0x6] sm:$0x3] %vm965_vm12, %v361_v27 }
  0x63   : > { %714 = shalt.err (!%p711_p1)
}
  0x64   : > { %s783_s18 = smov 32   ;;  %s784_s22 = smov 2  }
  0x65   : > { %534 = dma.vmem_to_hbm [thread:$0]  (%p857_p8), %s1004_s7, 128, %s381_s8, %s365_s11, %s783_s18, %s783_s18, %s784_s22  }
  0x66 PF: > { %s395_s26 = sand.u32 1, %s757_s12   ;;  %p548_p2 = pnand %p493_p13, %p861_p9 }
  0x67   : > { %s396_s21 = scalar_lea.sflag [#allocation4], %s395_s26 }
  0x68   : > { %p549_p4 = pneg %p548_p2 }
  0x6a   : > { %752 = dma.done.wait (%p549_p4), %s396_s21, 128  }
  0x6b   : > { %754 = vsyncadd (%p549_p4), %s396_s21, 4294967168  ;;  %s21_s17 = sadd.s32 1, %s777_s17   ;;  %s1080_s12 = smov %s761_s13 }
  0x6c   : > { %p18_p6 = scmp.ge.s32.totalorder %s21_s17, 4   ;;  %s1081_s13 = smov %s765_s14 }
  0x6d   : > { %s1082_s14 = smov %s902_s5  ;;  %s1083_s15 = smov %s773_s16 }
  0x6e   : > { %s1084_s16 = smov %s1086_s9  ;;  %20 = sbr.rel (!%p18_p6) target bundleno = 10 (0xa), region = 92 }
  0x73   :  { %402 = vsyncpa [#allocation3], 1 }
  0x74   :  { %404 = vsyncpa [#allocation3 + $0x1], 1 }
  0x75   :  { %405 = vsyncpa [#allocation4], 1 }
  0x76   :  { %407 = vsyncpa [#allocation4 + $0x1], 1 }
  0x77   :  { %408 = vsyncpa [#allocation5], 1 }
  0x78   :  { %410 = vsyncpa [#allocation5 + $0x1], 1 }
  0x79   :  { %411 = vsyncpa [#allocation8], 1 }

</bundles_post_ra>
